<compile_context>
chip_gen: v5e
topology: v5e:2x2
jax: 0.10.0
libtpu: 0.0.40
codegen_flags: <defaults>
</compile_context>

<pallas_src>
import functools
import math

import jax
import jax.numpy as jnp
from jax import lax
from jax.experimental import pallas as pl
from jax.experimental.pallas import tpu as pltpu

EPS = 1e-5


def _round_up(x, m):
    return -(-x // m) * m


# ----------------------------------------------------------------------------
# Wrapper-side (tiny, XLA) helpers.
# ----------------------------------------------------------------------------
def _toeplitz_weights(w_hwio, w_in, k_pad, wo_pad, wo_valid):
    """[3,3,Ci,Co] -> [3*k_pad, wo_pad*Co] stacked block-banded matrix.

    Block dy (rows [dy*k_pad, dy*k_pad + w_in*Ci)) satisfies
      blk[x*Ci + c, xo*Co + co] = w[dy, x - xo, c, co]   if 0 <= x-xo < 3
                                                          and xo < wo_valid,
    else 0, so ONE matmul of the K-concatenated row-shifted slab against it is
    the valid 3x3 conv along W plus the channel contraction.  Rows beyond
    w_in*Ci in each block are zero (input lane padding).
    """
    kh, kw, ci, co = w_hwio.shape
    wi = jnp.arange(w_in)[:, None]
    xo = jnp.arange(wo_pad)[None, :]
    col_ok = xo < wo_valid
    blocks = []
    for dy in range(kh):
        acc = jnp.zeros((w_in, ci, wo_pad, co), jnp.float32)
        for dx in range(kw):
            sel = ((wi == xo + dx) & col_ok).astype(jnp.float32)
            acc = acc + sel[:, None, :, None] * w_hwio[dy, dx][None, :, None, :]
        blk = acc.reshape(w_in * ci, wo_pad * co)
        blocks.append(jnp.pad(blk, ((0, k_pad - w_in * ci), (0, 0))))
    return jnp.concatenate(blocks, axis=0)


def _channel_gather(wo_pad, c, wo_valid):
    """[wo_pad*c, c] 0/1 matrix: lane (xo*c + co) -> channel co for valid xo."""
    valid = (jnp.arange(wo_pad) < wo_valid).astype(jnp.float32)
    eye = jnp.eye(c, dtype=jnp.float32)
    return (valid[:, None, None] * eye[None]).reshape(wo_pad * c, c)


def _block_diag2(m):
    """[[m, 0], [0, m]] — lets sums and sums-of-squares share one MXU pass."""
    z = jnp.zeros_like(m)
    top = jnp.concatenate([m, z], axis=1)
    bot = jnp.concatenate([z, m], axis=1)
    return jnp.concatenate([top, bot], axis=0)


# ----------------------------------------------------------------------------
# Fused kernel: (conv -> BN(batch stats) -> ReLU) x 2, everything in VMEM.
# ----------------------------------------------------------------------------
def _double_conv_kernel(n, h, count1, count2,
                        x_ref, w1_ref, w2_ref,
                        g1_ref, be1_ref, g2_ref, be2_ref,
                        G1b_ref, G1tb_ref, G2b_ref, G2tb_ref,
                        out_ref, t1_ref, lhs1_ref, lhs2_ref):
    r = out_ref.shape[0]                       # 8-aligned tall row count

    def row_valid(ho):
        # Division-free periodic predicate on a [r, 1] iota column: tall row i
        # is a valid conv-output row iff i in [k*h, k*h + ho) for some image k.
        row = lax.broadcasted_iota(jnp.int32, (r, 1), 0)
        v = row < ho
        for k in range(1, n):
            v = v | ((row >= k * h) & (row < k * h + ho))
        return v

    def conv_bn_relu(src_ref, lhs_ref, w_ref, g_ref, be_ref, gbig_ref,
                     gtbig_ref, ho, count):
        kb = src_ref.shape[1]                  # per-tap K block (128-multiple)
        # Stage the three dy-shifted copies as one K-concatenated LHS (lane
        # offsets are 128-aligned), then a single MXU matmul against the
        # stacked Toeplitz weights — one fill/drain instead of three.
        for dy in range(3):
            lhs_ref[:, dy * kb:(dy + 1) * kb] = src_ref[dy:dy + r, :]
        y = jnp.dot(lhs_ref[...], w_ref[...], preferred_element_type=jnp.float32)

        # One-pass masked BN statistics.  [sum | sum_sq] share a single
        # [1, 2L] x [2L, 2C] block-diagonal gather matmul.
        ym = jnp.where(row_valid(ho), y, 0.0)
        s = jnp.sum(ym, axis=0, keepdims=True)
        q = jnp.sum(ym * ym, axis=0, keepdims=True)
        sq_c = jnp.dot(jnp.concatenate([s, q], axis=1), gbig_ref[...],
                       preferred_element_type=jnp.float32) * (1.0 / count)
        c = gbig_ref.shape[1] // 2
        mean_c = sq_c[:, :c]
        var_c = jnp.maximum(sq_c[:, c:] - mean_c * mean_c, 0.0)
        # Fold BN + affine into one FMA: per-channel scale/shift, broadcast
        # back to lanes with a single [1, 2C] x [2C, 2L] gather matmul.
        scale_c = g_ref[...] * lax.rsqrt(var_c + EPS)
        shift_c = be_ref[...] - mean_c * scale_c
        ss_l = jnp.dot(jnp.concatenate([scale_c, shift_c], axis=1),
                       gtbig_ref[...], preferred_element_type=jnp.float32)
        lanes = gtbig_ref.shape[1] // 2
        return jnp.maximum(y * ss_l[:, :lanes] + ss_l[:, lanes:], 0.0)

    # Layer 1: rows come straight from the padded input slab in VMEM.
    t1_ref[0:r, :] = conv_bn_relu(x_ref, lhs1_ref, w1_ref, g1_ref, be1_ref,
                                  G1b_ref, G1tb_ref, h - 2, count1)
    # Zero the 8-row tail so layer-2's dy=1,2 shifted reads stay finite.
    t1_ref[r:r + 8, :] = jnp.zeros((8, t1_ref.shape[1]), jnp.float32)
    # Layer 2: reads layer-1 activations from VMEM scratch (no HBM round trip).
    out_ref[...] = conv_bn_relu(t1_ref, lhs2_ref, w2_ref, g2_ref, be2_ref,
                                G2b_ref, G2tb_ref, h - 4, count2)


@jax.jit
def double_conv(x, params):
    """x: [N, H, W, Cin] f32 (NHWC).  params: w1/w2 HWIO, g*/be* per-channel."""
    n, h, w, cin = x.shape
    assert h > 4 and w > 4, "two valid 3x3 convs need H, W > 4"
    w1, w2 = params["w1"], params["w2"]
    c1, c2 = w1.shape[-1], w2.shape[-1]
    ho1, wo1 = h - 2, w - 2
    ho2, wo2 = ho1 - 2, wo1 - 2
    # Invariant the kernel relies on: layer-2 taps (xo2 + dx < wo1) never read
    # layer-1 lane padding (and padded layer-1 lanes are exactly 0 anyway).
    assert wo2 + 2 == wo1

    # Lane padding: wp*Cout a multiple of 128 (lane-dense stores), input slab
    # lane width a multiple of 128 (aligned staged K blocks).
    wp1 = _round_up(wo1, 128 // math.gcd(c1, 128))
    wp2 = _round_up(wo2, 128 // math.gcd(c2, 128))
    l1, l2 = wp1 * c1, wp2 * c2
    k0 = w * cin
    k0p = _round_up(k0, 128)

    # Sublane padding: 8-aligned tall row count; x / t1 carry 8 extra rows so
    # the dy=1,2 shifted reads never run off the end (extras are zero/garbage
    # and only feed rows that are masked out of the BN stats and dropped).
    r = _round_up(n * h, 8)
    rx = r + 8

    x2d = jnp.pad(x.reshape(n * h, k0).astype(jnp.float32),
                  ((0, rx - n * h), (0, k0p - k0)))

    w1s = _toeplitz_weights(w1, w, k0p, wp1, wo1)       # [3*k0p, L1]
    w2s = _toeplitz_weights(w2, wp1, l1, wp2, wo2)      # [3*L1,  L2]
    G1 = _channel_gather(wp1, c1, wo1)                  # [L1, C1]
    G2 = _channel_gather(wp2, c2, wo2)                  # [L2, C2]
    G1b, G1tb = _block_diag2(G1), _block_diag2(G1.T)
    G2b, G2tb = _block_diag2(G2), _block_diag2(G2.T)
    g1 = params["g1"].reshape(1, c1).astype(jnp.float32)
    be1 = params["be1"].reshape(1, c1).astype(jnp.float32)
    g2 = params["g2"].reshape(1, c2).astype(jnp.float32)
    be2 = params["be2"].reshape(1, c2).astype(jnp.float32)

    count1 = float(n * ho1 * wo1)
    count2 = float(n * ho2 * wo2)

    # Whole-problem-in-VMEM footprint guard (inputs + output + scratch).
    vmem_bytes = 4 * (rx * k0p + 3 * k0p * l1 + 3 * l1 * l2
                      + 2 * (c1 + c2)
                      + 2 * (2 * l1 * 2 * c1) + 2 * (2 * l2 * 2 * c2)
                      + r * l2
                      + rx * l1 + r * 3 * k0p + r * 3 * l1)
    assert vmem_bytes < 24 * 1024 * 1024, (
        "DoubleConv slab exceeds the single-VMEM-block budget; implement the "
        "M-tiled two-pass-BN grid (see TODO).")

    vmem = pl.BlockSpec(memory_space=pltpu.MemorySpace.VMEM)
    out2d = pl.pallas_call(
        functools.partial(_double_conv_kernel, n, h, count1, count2),
        out_shape=jax.ShapeDtypeStruct((r, l2), jnp.float32),
        in_specs=[vmem] * 11,
        out_specs=vmem,
        scratch_shapes=[pltpu.VMEM((rx, l1), jnp.float32),       # t1
                        pltpu.VMEM((r, 3 * k0p), jnp.float32),   # lhs1
                        pltpu.VMEM((r, 3 * l1), jnp.float32)],   # lhs2
        compiler_params=pltpu.CompilerParams(vmem_limit_bytes=32 * 1024 * 1024),
    )(x2d, w1s, w2s, g1, be1, g2, be2, G1b, G1tb, G2b, G2tb)

    # Tall slab -> [N, Ho2, Wo2, C2]: plain reshape + slice (no gather) — the
    # slab keeps h rows per image; garbage rows / padded lanes are dropped.
    return out2d[: n * h].reshape(n, h, wp2, c2)[:, :ho2, :wo2, :]


# ----------------------------------------------------------------------------
# Pure-JAX reference (true module semantics: conv WITH bias, BN batch stats).
# ----------------------------------------------------------------------------
def _ref_layer(x, w_hwio, b, g, be):
    y = lax.conv_general_dilated(
        x, w_hwio, window_strides=(1, 1), padding="VALID",
        dimension_numbers=("NHWC", "HWIO", "NHWC"))
    y = y + b.reshape(1, 1, 1, -1)
    mean = jnp.mean(y, axis=(0, 1, 2), keepdims=True)
    var = jnp.mean((y - mean) ** 2, axis=(0, 1, 2), keepdims=True)
    y = (y - mean) / jnp.sqrt(var + EPS)
    y = y * g.reshape(1, 1, 1, -1) + be.reshape(1, 1, 1, -1)
    return jnp.maximum(y, 0.0)


def _ref_double_conv(x, raw):
    y = _ref_layer(x, raw["w1"], raw["b1"], raw["g1"], raw["be1"])
    return _ref_layer(y, raw["w2"], raw["b2"], raw["g2"], raw["be2"])


if __name__ == "__main__":
    key = jax.random.PRNGKey(0)
    ks = jax.random.split(key, 9)

    N, H, W = 2, 16, 16
    C_IN, C_OUT = 4, 8

    # Deterministic synthetic parameters (shapes follow DoubleConv.__init__).
    # Conv weights in HWIO; PyTorch [Cout,Cin,kh,kw] corresponds via (2,3,1,0).
    raw = {
        "w1":  jax.random.normal(ks[0], (3, 3, C_IN, C_OUT), jnp.float32) * 0.2,
        "b1":  jax.random.normal(ks[1], (C_OUT,), jnp.float32) * 0.1,
        "g1":  1.0 + 0.1 * jax.random.normal(ks[2], (C_OUT,), jnp.float32),
        "be1": 0.1 * jax.random.normal(ks[3], (C_OUT,), jnp.float32),
        "w2":  jax.random.normal(ks[4], (3, 3, C_OUT, C_OUT), jnp.float32) * 0.2,
        "b2":  jax.random.normal(ks[5], (C_OUT,), jnp.float32) * 0.1,
        "g2":  1.0 + 0.1 * jax.random.normal(ks[6], (C_OUT,), jnp.float32),
        "be2": 0.1 * jax.random.normal(ks[7], (C_OUT,), jnp.float32),
    }
    # Conv biases intentionally NOT passed to the kernel — a pre-BN per-channel
    # bias is cancelled exactly by training-mode BN (reference keeps them).
    params = {k: raw[k] for k in ("w1", "g1", "be1", "w2", "g2", "be2")}

    # PyTorch-layout input [N, Cin, H, W] -> NHWC for the kernel.
    x_nchw = jax.random.normal(ks[8], (N, C_IN, H, W), jnp.float32)
    x = jnp.transpose(x_nchw, (0, 2, 3, 1))

    out = jax.block_until_ready(double_conv(x, params))
    assert out.shape == (N, H - 4, W - 4, C_OUT), out.shape

    ref = jax.block_until_ready(_ref_double_conv(x, raw))
    err = float(jnp.max(jnp.abs(out - ref)))
    assert jnp.allclose(out, ref, atol=2e-3, rtol=2e-3), err

    print("KERNEL_OK")
</pallas_src>

<mosaic_0001>
module attributes {stable_mosaic.version = 11 : i64} {
  func.func @_double_conv_kernel(%arg0: memref<40x128xf32, #tpu.memory_space<vmem>>, %arg1: memref<384x128xf32, #tpu.memory_space<vmem>>, %arg2: memref<384x128xf32, #tpu.memory_space<vmem>>, %arg3: memref<1x8xf32, #tpu.memory_space<vmem>>, %arg4: memref<1x8xf32, #tpu.memory_space<vmem>>, %arg5: memref<1x8xf32, #tpu.memory_space<vmem>>, %arg6: memref<1x8xf32, #tpu.memory_space<vmem>>, %arg7: memref<256x16xf32, #tpu.memory_space<vmem>>, %arg8: memref<16x256xf32, #tpu.memory_space<vmem>>, %arg9: memref<256x16xf32, #tpu.memory_space<vmem>>, %arg10: memref<16x256xf32, #tpu.memory_space<vmem>>, %arg11: memref<32x128xf32, #tpu.memory_space<vmem>>, %arg12: memref<40x128xf32, #tpu.memory_space<vmem>>, %arg13: memref<32x384xf32, #tpu.memory_space<vmem>>, %arg14: memref<32x384xf32, #tpu.memory_space<vmem>>) attributes {dimension_semantics = [], scalar_prefetch = 0 : i64, scratch_operands = 3 : i64, tpu.core_type = #tpu.core_type<tc>} {
    %c0 = arith.constant 0 : index
    %c0_0 = arith.constant 0 : index
    %0 = vector.load %arg0[%c0, %c0_0] : memref<40x128xf32, #tpu.memory_space<vmem>>, vector<32x128xf32>
    %c0_1 = arith.constant 0 : index
    %c0_2 = arith.constant 0 : index
    %1 = vector.load %arg13[%c0_1, %c0_2] : memref<32x384xf32, #tpu.memory_space<vmem>>, vector<32x128xf32>
    tpu.vector_store %arg13[%c0_1, %c0_2], %0 {strides = array<i32>} : memref<32x384xf32, #tpu.memory_space<vmem>>, vector<32x128xf32>,
    %c1 = arith.constant 1 : index
    %c0_3 = arith.constant 0 : index
    %2 = vector.load %arg0[%c1, %c0_3] : memref<40x128xf32, #tpu.memory_space<vmem>>, vector<32x128xf32>
    %c0_4 = arith.constant 0 : index
    %c128 = arith.constant 128 : index
    %3 = vector.load %arg13[%c0_4, %c128] : memref<32x384xf32, #tpu.memory_space<vmem>>, vector<32x128xf32>
    tpu.vector_store %arg13[%c0_4, %c128], %2 {strides = array<i32>} : memref<32x384xf32, #tpu.memory_space<vmem>>, vector<32x128xf32>,
    %c2 = arith.constant 2 : index
    %c0_5 = arith.constant 0 : index
    %4 = vector.load %arg0[%c2, %c0_5] : memref<40x128xf32, #tpu.memory_space<vmem>>, vector<32x128xf32>
    %c0_6 = arith.constant 0 : index
    %c256 = arith.constant 256 : index
    %5 = vector.load %arg13[%c0_6, %c256] : memref<32x384xf32, #tpu.memory_space<vmem>>, vector<32x128xf32>
    tpu.vector_store %arg13[%c0_6, %c256], %4 {strides = array<i32>} : memref<32x384xf32, #tpu.memory_space<vmem>>, vector<32x128xf32>,
    %c0_7 = arith.constant 0 : index
    %c0_8 = arith.constant 0 : index
    %6 = vector.load %arg13[%c0_7, %c0_8] : memref<32x384xf32, #tpu.memory_space<vmem>>, vector<32x384xf32>
    %c0_9 = arith.constant 0 : index
    %c0_10 = arith.constant 0 : index
    %7 = vector.load %arg1[%c0_9, %c0_10] : memref<384x128xf32, #tpu.memory_space<vmem>>, vector<384x128xf32>
    %cst = arith.constant dense<0.000000e+00> : vector<32x128xf32>
    %8 = tpu.matmul %6, %7, %cst {dimension_numbers = #tpu.dot_dimension_numbers<[1], [0], [0], [1], [0, 0, 1, 1], [], []>} : vector<32x384xf32>, vector<384x128xf32>, vector<32x128xf32> -> vector<32x128xf32>
    %9 = tpu.iota {dimensions = array<i32: 0>} : vector<32x1xi32>
    %c14_i32 = arith.constant 14 : i32
    %10 = vector.broadcast %c14_i32 : i32 to vector<32x1xi32>
    %11 = arith.cmpi slt, %9, %10 : vector<32x1xi32>
    %c16_i32 = arith.constant 16 : i32
    %12 = vector.broadcast %c16_i32 : i32 to vector<32x1xi32>
    %13 = arith.cmpi sge, %9, %12 : vector<32x1xi32>
    %c30_i32 = arith.constant 30 : i32
    %14 = vector.broadcast %c30_i32 : i32 to vector<32x1xi32>
    %15 = arith.cmpi slt, %9, %14 : vector<32x1xi32>
    %16 = arith.andi %13, %15 : vector<32x1xi1>
    %17 = arith.ori %11, %16 : vector<32x1xi1>
    %cst_11 = arith.constant 0.000000e+00 : f32
    %18 = vector.shape_cast %17 : vector<32x1xi1> to vector<32x1xi1>
    %19 = vector.broadcast %18 : vector<32x1xi1> to vector<32x128xi1>
    %20 = vector.broadcast %cst_11 : f32 to vector<32x128xf32>
    %21 = arith.select %19, %8, %20 : vector<32x128xi1>, vector<32x128xf32>
    %cst_12 = arith.constant dense<0.000000e+00> : vector<128xf32>
    %22 = vector.multi_reduction <add>, %21, %cst_12 [0] : vector<32x128xf32> to vector<128xf32>
    %23 = vector.shape_cast %22 : vector<128xf32> to vector<1x128xf32>
    %24 = arith.mulf %21, %21 : vector<32x128xf32>
    %cst_13 = arith.constant dense<0.000000e+00> : vector<128xf32>
    %25 = vector.multi_reduction <add>, %24, %cst_13 [0] : vector<32x128xf32> to vector<128xf32>
    %26 = vector.shape_cast %25 : vector<128xf32> to vector<1x128xf32>
    %27 = tpu.concatenate %23, %26 in 1 : vector<1x128xf32>, vector<1x128xf32> -> vector<1x256xf32>
    %c0_14 = arith.constant 0 : index
    %c0_15 = arith.constant 0 : index
    %28 = vector.load %arg7[%c0_14, %c0_15] : memref<256x16xf32, #tpu.memory_space<vmem>>, vector<256x16xf32>
    %cst_16 = arith.constant dense<0.000000e+00> : vector<1x16xf32>
    %29 = tpu.matmul %27, %28, %cst_16 {dimension_numbers = #tpu.dot_dimension_numbers<[1], [0], [0], [1], [0, 0, 1, 1], [], []>} : vector<1x256xf32>, vector<256x16xf32>, vector<1x16xf32> -> vector<1x16xf32>
    %cst_17 = arith.constant 0.00255102036 : f32
    %30 = vector.broadcast %cst_17 : f32 to vector<1x16xf32>
    %31 = arith.mulf %29, %30 : vector<1x16xf32>
    %32 = vector.extract_strided_slice %31 {offsets = [0, 0], sizes = [1, 8], strides = [1, 1]} : vector<1x16xf32> to vector<1x8xf32>
    %33 = vector.extract_strided_slice %31 {offsets = [0, 8], sizes = [1, 8], strides = [1, 1]} : vector<1x16xf32> to vector<1x8xf32>
    %34 = arith.mulf %32, %32 : vector<1x8xf32>
    %35 = arith.subf %33, %34 : vector<1x8xf32>
    %cst_18 = arith.constant 0.000000e+00 : f32
    %36 = vector.broadcast %cst_18 : f32 to vector<1x8xf32>
    %37 = arith.maximumf %35, %36 : vector<1x8xf32>
    %c0_19 = arith.constant 0 : index
    %c0_20 = arith.constant 0 : index
    %38 = vector.load %arg3[%c0_19, %c0_20] : memref<1x8xf32, #tpu.memory_space<vmem>>, vector<1x8xf32>
    %cst_21 = arith.constant 9.99999974E-6 : f32
    %39 = vector.broadcast %cst_21 : f32 to vector<1x8xf32>
    %40 = arith.addf %37, %39 : vector<1x8xf32>
    %41 = math.rsqrt %40 : vector<1x8xf32>
    %42 = arith.mulf %38, %41 : vector<1x8xf32>
    %c0_22 = arith.constant 0 : index
    %c0_23 = arith.constant 0 : index
    %43 = vector.load %arg4[%c0_22, %c0_23] : memref<1x8xf32, #tpu.memory_space<vmem>>, vector<1x8xf32>
    %44 = arith.mulf %32, %42 : vector<1x8xf32>
    %45 = arith.subf %43, %44 : vector<1x8xf32>
    %46 = tpu.concatenate %42, %45 in 1 : vector<1x8xf32>, vector<1x8xf32> -> vector<1x16xf32>
    %c0_24 = arith.constant 0 : index
    %c0_25 = arith.constant 0 : index
    %47 = vector.load %arg8[%c0_24, %c0_25] : memref<16x256xf32, #tpu.memory_space<vmem>>, vector<16x256xf32>
    %cst_26 = arith.constant dense<0.000000e+00> : vector<1x256xf32>
    %48 = tpu.matmul %46, %47, %cst_26 {dimension_numbers = #tpu.dot_dimension_numbers<[1], [0], [0], [1], [0, 0, 1, 1], [], []>} : vector<1x16xf32>, vector<16x256xf32>, vector<1x256xf32> -> vector<1x256xf32>
    %49 = vector.extract_strided_slice %48 {offsets = [0, 0], sizes = [1, 128], strides = [1, 1]} : vector<1x256xf32> to vector<1x128xf32>
    %50 = vector.broadcast %49 : vector<1x128xf32> to vector<32x128xf32>
    %51 = arith.mulf %8, %50 : vector<32x128xf32>
    %52 = vector.extract_strided_slice %48 {offsets = [0, 128], sizes = [1, 128], strides = [1, 1]} : vector<1x256xf32> to vector<1x128xf32>
    %53 = vector.broadcast %52 : vector<1x128xf32> to vector<32x128xf32>
    %54 = arith.addf %51, %53 : vector<32x128xf32>
    %cst_27 = arith.constant 0.000000e+00 : f32
    %55 = vector.broadcast %cst_27 : f32 to vector<32x128xf32>
    %56 = arith.maximumf %54, %55 : vector<32x128xf32>
    %c0_28 = arith.constant 0 : index
    %c0_29 = arith.constant 0 : index
    %57 = vector.load %arg12[%c0_28, %c0_29] : memref<40x128xf32, #tpu.memory_space<vmem>>, vector<32x128xf32>
    tpu.vector_store %arg12[%c0_28, %c0_29], %56 {strides = array<i32>} : memref<40x128xf32, #tpu.memory_space<vmem>>, vector<32x128xf32>,
    %cst_30 = arith.constant 0.000000e+00 : f32
    %58 = vector.broadcast %cst_30 : f32 to vector<8x128xf32>
    %c32 = arith.constant 32 : index
    %c0_31 = arith.constant 0 : index
    %59 = vector.load %arg12[%c32, %c0_31] : memref<40x128xf32, #tpu.memory_space<vmem>>, vector<8x128xf32>
    tpu.vector_store %arg12[%c32, %c0_31], %58 {strides = array<i32>} : memref<40x128xf32, #tpu.memory_space<vmem>>, vector<8x128xf32>,
    %c0_32 = arith.constant 0 : index
    %c0_33 = arith.constant 0 : index
    %60 = vector.load %arg12[%c0_32, %c0_33] : memref<40x128xf32, #tpu.memory_space<vmem>>, vector<32x128xf32>
    %c0_34 = arith.constant 0 : index
    %c0_35 = arith.constant 0 : index
    %61 = vector.load %arg14[%c0_34, %c0_35] : memref<32x384xf32, #tpu.memory_space<vmem>>, vector<32x128xf32>
    tpu.vector_store %arg14[%c0_34, %c0_35], %60 {strides = array<i32>} : memref<32x384xf32, #tpu.memory_space<vmem>>, vector<32x128xf32>,
    %c1_36 = arith.constant 1 : index
    %c0_37 = arith.constant 0 : index
    %62 = vector.load %arg12[%c1_36, %c0_37] : memref<40x128xf32, #tpu.memory_space<vmem>>, vector<32x128xf32>
    %c0_38 = arith.constant 0 : index
    %c128_39 = arith.constant 128 : index
    %63 = vector.load %arg14[%c0_38, %c128_39] : memref<32x384xf32, #tpu.memory_space<vmem>>, vector<32x128xf32>
    tpu.vector_store %arg14[%c0_38, %c128_39], %62 {strides = array<i32>} : memref<32x384xf32, #tpu.memory_space<vmem>>, vector<32x128xf32>,
    %c2_40 = arith.constant 2 : index
    %c0_41 = arith.constant 0 : index
    %64 = vector.load %arg12[%c2_40, %c0_41] : memref<40x128xf32, #tpu.memory_space<vmem>>, vector<32x128xf32>
    %c0_42 = arith.constant 0 : index
    %c256_43 = arith.constant 256 : index
    %65 = vector.load %arg14[%c0_42, %c256_43] : memref<32x384xf32, #tpu.memory_space<vmem>>, vector<32x128xf32>
    tpu.vector_store %arg14[%c0_42, %c256_43], %64 {strides = array<i32>} : memref<32x384xf32, #tpu.memory_space<vmem>>, vector<32x128xf32>,
    %c0_44 = arith.constant 0 : index
    %c0_45 = arith.constant 0 : index
    %66 = vector.load %arg14[%c0_44, %c0_45] : memref<32x384xf32, #tpu.memory_space<vmem>>, vector<32x384xf32>
    %c0_46 = arith.constant 0 : index
    %c0_47 = arith.constant 0 : index
    %67 = vector.load %arg2[%c0_46, %c0_47] : memref<384x128xf32, #tpu.memory_space<vmem>>, vector<384x128xf32>
    %cst_48 = arith.constant dense<0.000000e+00> : vector<32x128xf32>
    %68 = tpu.matmul %66, %67, %cst_48 {dimension_numbers = #tpu.dot_dimension_numbers<[1], [0], [0], [1], [0, 0, 1, 1], [], []>} : vector<32x384xf32>, vector<384x128xf32>, vector<32x128xf32> -> vector<32x128xf32>
    %69 = tpu.iota {dimensions = array<i32: 0>} : vector<32x1xi32>
    %c12_i32 = arith.constant 12 : i32
    %70 = vector.broadcast %c12_i32 : i32 to vector<32x1xi32>
    %71 = arith.cmpi slt, %69, %70 : vector<32x1xi32>
    %c16_i32_49 = arith.constant 16 : i32
    %72 = vector.broadcast %c16_i32_49 : i32 to vector<32x1xi32>
    %73 = arith.cmpi sge, %69, %72 : vector<32x1xi32>
    %c28_i32 = arith.constant 28 : i32
    %74 = vector.broadcast %c28_i32 : i32 to vector<32x1xi32>
    %75 = arith.cmpi slt, %69, %74 : vector<32x1xi32>
    %76 = arith.andi %73, %75 : vector<32x1xi1>
    %77 = arith.ori %71, %76 : vector<32x1xi1>
    %cst_50 = arith.constant 0.000000e+00 : f32
    %78 = vector.shape_cast %77 : vector<32x1xi1> to vector<32x1xi1>
    %79 = vector.broadcast %78 : vector<32x1xi1> to vector<32x128xi1>
    %80 = vector.broadcast %cst_50 : f32 to vector<32x128xf32>
    %81 = arith.select %79, %68, %80 : vector<32x128xi1>, vector<32x128xf32>
    %cst_51 = arith.constant dense<0.000000e+00> : vector<128xf32>
    %82 = vector.multi_reduction <add>, %81, %cst_51 [0] : vector<32x128xf32> to vector<128xf32>
    %83 = vector.shape_cast %82 : vector<128xf32> to vector<1x128xf32>
    %84 = arith.mulf %81, %81 : vector<32x128xf32>
    %cst_52 = arith.constant dense<0.000000e+00> : vector<128xf32>
    %85 = vector.multi_reduction <add>, %84, %cst_52 [0] : vector<32x128xf32> to vector<128xf32>
    %86 = vector.shape_cast %85 : vector<128xf32> to vector<1x128xf32>
    %87 = tpu.concatenate %83, %86 in 1 : vector<1x128xf32>, vector<1x128xf32> -> vector<1x256xf32>
    %c0_53 = arith.constant 0 : index
    %c0_54 = arith.constant 0 : index
    %88 = vector.load %arg9[%c0_53, %c0_54] : memref<256x16xf32, #tpu.memory_space<vmem>>, vector<256x16xf32>
    %cst_55 = arith.constant dense<0.000000e+00> : vector<1x16xf32>
    %89 = tpu.matmul %87, %88, %cst_55 {dimension_numbers = #tpu.dot_dimension_numbers<[1], [0], [0], [1], [0, 0, 1, 1], [], []>} : vector<1x256xf32>, vector<256x16xf32>, vector<1x16xf32> -> vector<1x16xf32>
    %cst_56 = arith.constant 0.00347222225 : f32
    %90 = vector.broadcast %cst_56 : f32 to vector<1x16xf32>
    %91 = arith.mulf %89, %90 : vector<1x16xf32>
    %92 = vector.extract_strided_slice %91 {offsets = [0, 0], sizes = [1, 8], strides = [1, 1]} : vector<1x16xf32> to vector<1x8xf32>
    %93 = vector.extract_strided_slice %91 {offsets = [0, 8], sizes = [1, 8], strides = [1, 1]} : vector<1x16xf32> to vector<1x8xf32>
    %94 = arith.mulf %92, %92 : vector<1x8xf32>
    %95 = arith.subf %93, %94 : vector<1x8xf32>
    %cst_57 = arith.constant 0.000000e+00 : f32
    %96 = vector.broadcast %cst_57 : f32 to vector<1x8xf32>
    %97 = arith.maximumf %95, %96 : vector<1x8xf32>
    %c0_58 = arith.constant 0 : index
    %c0_59 = arith.constant 0 : index
    %98 = vector.load %arg5[%c0_58, %c0_59] : memref<1x8xf32, #tpu.memory_space<vmem>>, vector<1x8xf32>
    %cst_60 = arith.constant 9.99999974E-6 : f32
    %99 = vector.broadcast %cst_60 : f32 to vector<1x8xf32>
    %100 = arith.addf %97, %99 : vector<1x8xf32>
    %101 = math.rsqrt %100 : vector<1x8xf32>
    %102 = arith.mulf %98, %101 : vector<1x8xf32>
    %c0_61 = arith.constant 0 : index
    %c0_62 = arith.constant 0 : index
    %103 = vector.load %arg6[%c0_61, %c0_62] : memref<1x8xf32, #tpu.memory_space<vmem>>, vector<1x8xf32>
    %104 = arith.mulf %92, %102 : vector<1x8xf32>
    %105 = arith.subf %103, %104 : vector<1x8xf32>
    %106 = tpu.concatenate %102, %105 in 1 : vector<1x8xf32>, vector<1x8xf32> -> vector<1x16xf32>
    %c0_63 = arith.constant 0 : index
    %c0_64 = arith.constant 0 : index
    %107 = vector.load %arg10[%c0_63, %c0_64] : memref<16x256xf32, #tpu.memory_space<vmem>>, vector<16x256xf32>
    %cst_65 = arith.constant dense<0.000000e+00> : vector<1x256xf32>
    %108 = tpu.matmul %106, %107, %cst_65 {dimension_numbers = #tpu.dot_dimension_numbers<[1], [0], [0], [1], [0, 0, 1, 1], [], []>} : vector<1x16xf32>, vector<16x256xf32>, vector<1x256xf32> -> vector<1x256xf32>
    %109 = vector.extract_strided_slice %108 {offsets = [0, 0], sizes = [1, 128], strides = [1, 1]} : vector<1x256xf32> to vector<1x128xf32>
    %110 = vector.broadcast %109 : vector<1x128xf32> to vector<32x128xf32>
    %111 = arith.mulf %68, %110 : vector<32x128xf32>
    %112 = vector.extract_strided_slice %108 {offsets = [0, 128], sizes = [1, 128], strides = [1, 1]} : vector<1x256xf32> to vector<1x128xf32>
    %113 = vector.broadcast %112 : vector<1x128xf32> to vector<32x128xf32>
    %114 = arith.addf %111, %113 : vector<32x128xf32>
    %cst_66 = arith.constant 0.000000e+00 : f32
    %115 = vector.broadcast %cst_66 : f32 to vector<32x128xf32>
    %116 = arith.maximumf %114, %115 : vector<32x128xf32>
    %c0_67 = arith.constant 0 : index
    %c0_68 = arith.constant 0 : index
    %117 = vector.load %arg11[%c0_67, %c0_68] : memref<32x128xf32, #tpu.memory_space<vmem>>, vector<32x128xf32>
    tpu.vector_store %arg11[%c0_67, %c0_68], %116 {strides = array<i32>} : memref<32x128xf32, #tpu.memory_space<vmem>>, vector<32x128xf32>,
    return
  }
}

</mosaic_0001>

<bundles_post_ra>
// kernel: double_conv.1
= control target key start
LH: loop header
LB: loop body
LE: loop exit
PB: predicated region body
PF: predicated region fallthrough
CT: control target
= control target key end

     0   :  { %s850_s23 = smov 120   ;;  %vm373_vm5 = vcmask 64512   ;;  %vm379_vm6 = vcmask 130048   ;;  %s1536_s1 = inlined_call_operand.vmem [shape: f32[384,128], index: 1, kind: input, shape index: {}]   ;;  %s1537_s0 = inlined_call_operand.vmem [shape: f32[40,128], index: 0, kind: input, shape index: {}]   ;;  %s1538_s7 = inlined_call_operand.vmem [shape: f32[256,16], index: 7, kind: input, shape index: {}]   ;;  %s1539_s8 = inlined_call_operand.vmem [shape: f32[16,256], index: 8, kind: input, shape index: {}]   ;;  %s1540_s3 = inlined_call_operand.vmem [shape: f32[1,8], index: 3, kind: input, shape index: {}]   ;;  %s1541_s4 = inlined_call_operand.vmem [shape: f32[1,8], index: 4, kind: input, shape index: {}]   ;;  %s1542_s2 = inlined_call_operand.vmem [shape: f32[384,128], index: 2, kind: input, shape index: {}]   ;;  %s1543_s9 = inlined_call_operand.vmem [shape: f32[256,16], index: 9, kind: input, shape index: {}]   ;;  %s1544_s10 = inlined_call_operand.vmem [shape: f32[16,256], index: 10, kind: input, shape index: {}]   ;;  %s1545_s5 = inlined_call_operand.vmem [shape: f32[1,8], index: 5, kind: input, shape index: {}]   ;;  %s1546_s6 = inlined_call_operand.vmem [shape: f32[1,8], index: 6, kind: input, shape index: {}]   ;;  %s1547_s11 = inlined_call_operand.vmem [shape: f32[32,128], index: 11, kind: output, shape index: {}]  }
   0x1   :  { %v121_v0 = vld [vmem:[%s1536_s1 + $0x178] sm:$0xff]  ;;  %v120_v1 = vld [vmem:[%s1536_s1 + $0x170] sm:$0xff]  ;;  %v119_v5 = vld [vmem:[%s1536_s1 + $0x168] sm:$0xff] }
   0x2   :  { %v89_v2 = vld [vmem:[%s1536_s1 + $0x78] sm:$0xff]  ;;  %180 = vmatpush.msra.mxu2 %v121_v0  ;;  %v88_v4 = vld [vmem:[%s1536_s1 + $0x70] sm:$0xff]  ;;  %v87_v7 = vld [vmem:[%s1536_s1 + $0x68] sm:$0xff] }
   0x3   :  { %122 = vmatpush.msra.mxu0 %v89_v2  ;;  %v105_v3 = vld [vmem:[%s1536_s1 + $0xf8] sm:$0xff]  ;;  %v104_v6 = vld [vmem:[%s1536_s1 + $0xf0] sm:$0xff]  ;;  %v103_v8 = vld [vmem:[%s1536_s1 + $0xe8] sm:$0xff] }
   0x4   :  { %151 = vmatpush.msra.mxu1 %v105_v3  ;;  %181 = vmatpush.msra.mxu2 %v120_v1  ;;  %v118_v9 = vld [vmem:[%s1536_s1 + $0x160] sm:$0xff]  ;;  %v117_v12 = vld [vmem:[%s1536_s1 + $0x158] sm:$0xff]  ;;  %v116_v15 = vld [vmem:[%s1536_s1 + $0x150] sm:$0xff] }
   0x5   :  { %123 = vmatpush.msra.mxu0 %v88_v4  ;;  %v86_v10 = vld [vmem:[%s1536_s1 + $0x60] sm:$0xff]  ;;  %v85_v13 = vld [vmem:[%s1536_s1 + $0x58] sm:$0xff]  ;;  %v84_v16 = vld [vmem:[%s1536_s1 + $0x50] sm:$0xff] }
   0x6   :  { %152 = vmatpush.msra.mxu1 %v104_v6  ;;  %182 = vmatpush.msra.mxu2 %v119_v5  ;;  %v102_v11 = vld [vmem:[%s1536_s1 + $0xe0] sm:$0xff]  ;;  %v101_v14 = vld [vmem:[%s1536_s1 + $0xd8] sm:$0xff]  ;;  %v100_v17 = vld [vmem:[%s1536_s1 + $0xd0] sm:$0xff] }
   0x7   :  { %124 = vmatpush.msra.mxu0 %v87_v7  ;;  %v115_v18 = vld [vmem:[%s1536_s1 + $0x148] sm:$0xff]  ;;  %v114_v21 = vld [vmem:[%s1536_s1 + $0x140] sm:$0xff]  ;;  %v113_v24 = vld [vmem:[%s1536_s1 + $0x138] sm:$0xff] }
   0x8   :  { %153 = vmatpush.msra.mxu1 %v103_v8  ;;  %183 = vmatpush.msra.mxu2 %v118_v9  ;;  %v83_v19 = vld [vmem:[%s1536_s1 + $0x48] sm:$0xff]  ;;  %v82_v22 = vld [vmem:[%s1536_s1 + $0x40] sm:$0xff]  ;;  %v81_v25 = vld [vmem:[%s1536_s1 + $0x38] sm:$0xff] }
   0x9   :  { %125 = vmatpush.msra.mxu0 %v86_v10  ;;  %v99_v20 = vld [vmem:[%s1536_s1 + $0xc8] sm:$0xff]  ;;  %v98_v23 = vld [vmem:[%s1536_s1 + $0xc0] sm:$0xff]  ;;  %v97_v26 = vld [vmem:[%s1536_s1 + $0xb8] sm:$0xff] }
   0xa   :  { %154 = vmatpush.msra.mxu1 %v102_v11  ;;  %184 = vmatpush.msra.mxu2 %v117_v12  ;;  %v112_v27 = vld [vmem:[%s1536_s1 + $0x130] sm:$0xff]  ;;  %v111_v30 = vld [vmem:[%s1536_s1 + $0x128] sm:$0xff]  ;;  %v110_v33 = vld [vmem:[%s1536_s1 + $0x120] sm:$0xff] }
   0xb   :  { %126 = vmatpush.msra.mxu0 %v85_v13  ;;  %v80_v28 = vld [vmem:[%s1536_s1 + $0x30] sm:$0xff]  ;;  %v79_v31 = vld [vmem:[%s1536_s1 + $0x28] sm:$0xff]  ;;  %v78_v34 = vld [vmem:[%s1536_s1 + $0x20] sm:$0xff] }
   0xc   :  { %155 = vmatpush.msra.mxu1 %v101_v14  ;;  %185 = vmatpush.msra.mxu2 %v116_v15  ;;  %v96_v29 = vld [vmem:[%s1536_s1 + $0xb0] sm:$0xff]  ;;  %v95_v32 = vld [vmem:[%s1536_s1 + $0xa8] sm:$0xff]  ;;  %v94_v35 = vld [vmem:[%s1536_s1 + $0xa0] sm:$0xff] }
   0xd   :  { %127 = vmatpush.msra.mxu0 %v84_v16  ;;  %v109_v36 = vld [vmem:[%s1536_s1 + $0x118] sm:$0xff]  ;;  %v108_v39 = vld [vmem:[%s1536_s1 + $0x110] sm:$0xff]  ;;  %v107_v42 = vld [vmem:[%s1536_s1 + $0x108] sm:$0xff] }
   0xe   :  { %156 = vmatpush.msra.mxu1 %v100_v17  ;;  %186 = vmatpush.msra.mxu2 %v115_v18  ;;  %v77_v37 = vld [vmem:[%s1536_s1 + $0x18] sm:$0xff]  ;;  %v76_v40 = vld [vmem:[%s1536_s1 + $0x10] sm:$0xff]  ;;  %v75_v43 = vld [vmem:[%s1536_s1 + $0x8] sm:$0xff] }
   0xf   :  { %128 = vmatpush.msra.mxu0 %v83_v19  ;;  %v93_v38 = vld [vmem:[%s1536_s1 + $0x98] sm:$0xff]  ;;  %v92_v41 = vld [vmem:[%s1536_s1 + $0x90] sm:$0xff]  ;;  %v91_v44 = vld [vmem:[%s1536_s1 + $0x88] sm:$0xff] }
  0x10   :  { %157 = vmatpush.msra.mxu1 %v99_v20  ;;  %187 = vmatpush.msra.mxu2 %v114_v21  ;;  %v106_v45 = vld [vmem:[%s1536_s1 + $0x100] sm:$0xff]  ;;  %v55_v51 = vld [vmem:[%s1537_s0 + $0xa] sm:$0xff]  ;;  %v56_v54 = vld [vmem:[%s1537_s0 + $0x12] sm:$0xff] }
  0x11   :  { %129 = vmatpush.msra.mxu0 %v82_v22  ;;  %v74_v46 = vld [vmem:[%s1536_s1] sm:$0xff]  ;;  %v39_v52 = vld [vmem:[%s1537_s0 + $0x8] sm:$0xff]  ;;  %v40_v55 = vld [vmem:[%s1537_s0 + $0x10] sm:$0xff] }
  0x12   :  { %158 = vmatpush.msra.mxu1 %v98_v23  ;;  %188 = vmatpush.msra.mxu2 %v113_v24  ;;  %v54_v47 = vld [vmem:[%s1537_s0 + $0x2] sm:$0xff]  ;;  %v48_v56 = vld [vmem:[%s1537_s0 + $0x11] sm:$0xff]  ;;  %v57_v57 = vld [vmem:[%s1537_s0 + $0x1a] sm:$0xff] }
  0x13   :  { %130 = vmatpush.msra.mxu0 %v81_v25  ;;  %v90_v48 = vld [vmem:[%s1536_s1 + $0x80] sm:$0xff]  ;;  %v47_v53 = vld [vmem:[%s1537_s0 + $0x9] sm:$0xff]  ;;  %v41_v58 = vld [vmem:[%s1537_s0 + $0x18] sm:$0xff] }
  0x14   :  { %159 = vmatpush.msra.mxu1 %v97_v26  ;;  %189 = vmatpush.msra.mxu2 %v112_v27  ;;  %v38_v49 = vld [vmem:[%s1537_s0] sm:$0xff]  ;;  %v283_v60 = vld [vmem:[%s1538_s7 + $0x78] sm:$0xff]  ;;  %v282_v61 = vld [vmem:[%s1538_s7 + $0x70] sm:$0xff] }
  0x15   :  { %131 = vmatpush.msra.mxu0 %v80_v28  ;;  %v46_v50 = vld [vmem:[%s1537_s0 + $0x1] sm:$0xff]  ;;  %v49_v59 = vld [vmem:[%s1537_s0 + $0x19] sm:$0xff]  ;;  %300 = vmatpush.msra.mxu3 %v283_v60  ;;  %v298_v0 = vld [vmem:[%s1538_s7 + $0xf0] sm:$0xff]  ;;  %v209_v28 = vlaneseq }
  0x16   :  { %160 = vmatpush.msra.mxu1 %v96_v29  ;;  %190 = vmatpush.msra.mxu2 %v111_v30  ;;  %v299_v62 = vld [vmem:[%s1538_s7 + $0xf8] sm:$0xff]  ;;  %v281_v63 = vld [vmem:[%s1538_s7 + $0x68] sm:$0xff]  ;;  %v280_v1 = vld [vmem:[%s1538_s7 + $0x60] sm:$0xff] }
  0x17   :  { %132 = vmatpush.msra.mxu0 %v79_v31  ;;  %301 = vmatpush.msra.mxu3 %v282_v61  ;;  %v297_v2 = vld [vmem:[%s1538_s7 + $0xe8] sm:$0xff]  ;;  %v279_v3 = vld [vmem:[%s1538_s7 + $0x58] sm:$0xff]  ;;  %v296_v4 = vld [vmem:[%s1538_s7 + $0xe0] sm:$0xff] }
  0x18   :  { %161 = vmatpush.msra.mxu1 %v95_v32  ;;  %191 = vmatpush.msra.mxu2 %v110_v33  ;;  %v278_v5 = vld [vmem:[%s1538_s7 + $0x50] sm:$0xff]  ;;  %v295_v6 = vld [vmem:[%s1538_s7 + $0xd8] sm:$0xff]  ;;  %v277_v7 = vld [vmem:[%s1538_s7 + $0x48] sm:$0xff] }
  0x19   :  { %133 = vmatpush.msra.mxu0 %v78_v34  ;;  %302 = vmatpush.msra.mxu3 %v281_v63  ;;  %v294_v8 = vld [vmem:[%s1538_s7 + $0xd0] sm:$0xff]  ;;  %v276_v9 = vld [vmem:[%s1538_s7 + $0x40] sm:$0xff]  ;;  %v293_v10 = vld [vmem:[%s1538_s7 + $0xc8] sm:$0xff]  ;;  %v210_v34 = vshrl.u32 %v209_v28, 7 }
  0x1a   :  { %162 = vmatpush.msra.mxu1 %v94_v35  ;;  %192 = vmatpush.msra.mxu2 %v109_v36  ;;  %v275_v11 = vld [vmem:[%s1538_s7 + $0x38] sm:$0xff]  ;;  %v292_v12 = vld [vmem:[%s1538_s7 + $0xc0] sm:$0xff]  ;;  %v274_v15 = vld [vmem:[%s1538_s7 + $0x30] sm:$0xff] }
  0x1b   :  { %134 = vmatpush.msra.mxu0 %v77_v37  ;;  %303 = vmatpush.msra.mxu3 %v280_v1  ;;  %v291_v16 = vld [vmem:[%s1538_s7 + $0xb8] sm:$0xff]  ;;  %v273_v17 = vld [vmem:[%s1538_s7 + $0x28] sm:$0xff]  ;;  %v290_v18 = vld [vmem:[%s1538_s7 + $0xb0] sm:$0xff] }
  0x1c   :  { %163 = vmatpush.msra.mxu1 %v93_v38  ;;  %193 = vmatpush.msra.mxu2 %v108_v39  ;;  %v272_v20 = vld [vmem:[%s1538_s7 + $0x20] sm:$0xff]  ;;  %v289_v21 = vld [vmem:[%s1538_s7 + $0xa8] sm:$0xff]  ;;  %v271_v22 = vld [vmem:[%s1538_s7 + $0x18] sm:$0xff]  ;;  %v1188_v39 = vadd.s32 8, %v210_v34 }
  0x1d   :  { %135 = vmatpush.msra.mxu0 %v76_v40  ;;  %304 = vmatpush.msra.mxu3 %v279_v3  ;;  %v288_v23 = vld [vmem:[%s1538_s7 + $0xa0] sm:$0xff]  ;;  %v270_v24 = vld [vmem:[%s1538_s7 + $0x10] sm:$0xff]  ;;  %v287_v27 = vld [vmem:[%s1538_s7 + $0x98] sm:$0xff] }
  0x1e   :  { %164 = vmatpush.msra.mxu1 %v92_v41  ;;  %194 = vmatpush.msra.mxu2 %v107_v42  ;;  %v269_v29 = vld [vmem:[%s1538_s7 + $0x8] sm:$0xff]  ;;  %v286_v30 = vld [vmem:[%s1538_s7 + $0x90] sm:$0xff]  ;;  %v268_v31 = vld [vmem:[%s1538_s7] sm:$0xff]  ;;  %vm215_vm0 = vcmp.lt.s32.totalorder %v1188_v39, 14  ;;  %vm614_vm7 = vcmp.lt.s32.totalorder %v1188_v39, 12 }
  0x1f   :  { %136 = vmatpush.msra.mxu0 %v75_v43  ;;  %305 = vmatpush.msra.mxu3 %v278_v5  ;;  %v285_v32 = vld [vmem:[%s1538_s7 + $0x88] sm:$0xff]  ;;  %v284_v35 = vld [vmem:[%s1538_s7 + $0x80] sm:$0xff]  ;;  %s849_s7 = smov 8   ;;  %v377_v28 = vld [vmem:[%s1539_s8 + $0x10] sm:$0xff] }
  0x20   :  { %165 = vmatpush.msra.mxu1 %v91_v44  ;;  %195 = vmatpush.msra.mxu2 %v106_v45 }
  0x21   :  { %137 = vmatpush.msra.mxu0 %v74_v46  ;;  %196 = vmatmul.f32.vlgmr.msra.gmra.mxu2 %v54_v47 }
  0x22   :  { %166 = vmatpush.msra.mxu1 %v90_v48  ;;  %138 = vmatmul.f32.vlgmr.msra.gmra.mxu0 %v38_v49  ;;  %v1198_v49 = vadd.s32 24, %v210_v34 }
  0x23   :  { %167 = vmatmul.f32.vlgmr.msra.gmra.mxu1 %v46_v50  ;;  %320 = vmatpush.msrb.mxu0 %v299_v62 }
  0x24   :  { %306 = vmatpush.msra.mxu3 %v277_v7  ;;  %vm225_vm1 = vcmp.lt.s32.totalorder %v1198_v49, 30  ;;  %vm620_vm8 = vcmp.lt.s32.totalorder %v1198_v49, 28 }
  0x25   :  { %321 = vmatpush.msrb.mxu0 %v298_v0 }
  0x26   :  { %307 = vmatpush.msra.mxu3 %v276_v9 }
  0x27   :  { %322 = vmatpush.msrb.mxu0 %v297_v2 }
  0x28   :  { %308 = vmatpush.msra.mxu3 %v275_v11 }
  0x29   :  { %199 = vmatmul.f32.gmra.mxu2 %v55_v51  ;;  %323 = vmatpush.msrb.mxu0 %v296_v4 }
  0x2a   :  { %141 = vmatmul.f32.gmra.mxu0 %v39_v52  ;;  %309 = vmatpush.msra.mxu3 %v274_v15 }
  0x2b   :  { %170 = vmatmul.f32.gmra.mxu1 %v47_v53  ;;  %324 = vmatpush.msrb.mxu0 %v295_v6 }
  0x2c   :  { %310 = vmatpush.msra.mxu3 %v273_v17 }
  0x2d   :  { %325 = vmatpush.msrb.mxu0 %v294_v8 }
  0x2e   :  { %311 = vmatpush.msra.mxu3 %v272_v20 }
  0x2f   :  { %326 = vmatpush.msrb.mxu0 %v293_v10 }
  0x30   :  { %312 = vmatpush.msra.mxu3 %v271_v22 }
  0x31   :  { %202 = vmatmul.f32.gmra.mxu2 %v56_v54  ;;  %327 = vmatpush.msrb.mxu0 %v292_v12 }
  0x32   :  { %144 = vmatmul.f32.gmra.mxu0 %v40_v55  ;;  %313 = vmatpush.msra.mxu3 %v270_v24 }
  0x33   :  { %173 = vmatmul.f32.gmra.mxu1 %v48_v56  ;;  %328 = vmatpush.msrb.mxu0 %v291_v16 }
  0x34   :  { %314 = vmatpush.msra.mxu3 %v269_v29  ;;  %v375_v29 = vld [vmem:[%s1539_s8] sm:$0xff] }
  0x35   :  { %329 = vmatpush.msrb.mxu0 %v290_v18 }
  0x36   :  { %315 = vmatpush.msra.mxu3 %v268_v31 }
  0x37   :  { %330 = vmatpush.msrb.mxu0 %v289_v21 }
  0x38   :  { %397 = vmatpush.msrb.mxu3 %v377_v28  ;;  %v495_v28 = vld [vmem:[%s1542_s2 + $0x88] sm:$0xff] }
  0x39   :  { %205 = vmatmul.f32.gmra.mxu2 %v57_v57  ;;  %331 = vmatpush.msrb.mxu0 %v288_v23 }
  0x3a   :  { %147 = vmatmul.f32.gmra.mxu0 %v41_v58  ;;  %398 = vmatpush.msrb.mxu3 %v375_v29  ;;  %v511_v29 = vld [vmem:[%s1542_s2 + $0x108] sm:$0xff] }
  0x3b   :  { %176 = vmatmul.f32.gmra.mxu1 %v49_v59  ;;  %332 = vmatpush.msrb.mxu0 %v287_v27 }
  0x3d   :  { %333 = vmatpush.msrb.mxu0 %v286_v30  ;;  %v348_v30 = vld [vmem:[%s1540_s3] sm:$0x1] }
  0x3f   :  { %334 = vmatpush.msrb.mxu0 %v285_v32 }
  0x41   :  { %335 = vmatpush.msrb.mxu0 %v284_v35 }
  0x9f   :  { %v139_v13 = vpop.f32.mrf.mxu0 }
  0xa0   :  { %v168_v14 = vpop.f32.mrf.mxu1 }
  0xa1   :  { %v169_v41 = vadd.f32 %v168_v14, %v139_v13 }
  0xa4   :  { %v197_v19 = vpop.f32.mrf.mxu2 }
  0xa5   :  { %v1194_v47 = vadd.f32 %v197_v19, %v169_v41  ;;  %v509_v41 = vld [vmem:[%s1542_s2 + $0xf8] sm:$0xff] }
  0xa6   :  { %555 = vmatpush.msrb.mxu2 %v509_v41 }
  0xa7   :  { %v142_v25 = vpop.f32.mrf.mxu0  ;;  %v255_v52 = vmul.f32 %v1194_v47, %v1194_v47 }
  0xa8   :  { %v171_v26 = vpop.f32.mrf.mxu1 }
  0xa9   :  { %v172_v36 = vadd.f32 %v171_v26, %v142_v25 }
  0xac   :  { %v200_v33 = vpop.f32.mrf.mxu2 }
  0xad   :  { %v1190_v40 = vadd.f32 %v200_v33, %v172_v36  ;;  %v365_v33 = vld [vmem:[%s1541_s4] sm:$0x1] }
  0xaf   :  { %v145_v37 = vpop.f32.mrf.mxu0  ;;  %v243_v44 = vsel %vm215_vm0, %v1190_v40, 0.0 }
  0xb0   :  { %v174_v38 = vpop.f32.mrf.mxu1  ;;  %v256_v51 = vmul.f32 %v243_v44, %v243_v44  ;;  %v246_v53 = vadd.f32 %v243_v44, %v1194_v47  ;;  %v492_v44 = vld [vmem:[%s1542_s2 + $0x70] sm:$0xff] }
  0xb1   :  { %v175_v42 = vadd.f32 %v174_v38, %v145_v37  ;;  %v378_v37 = vld [vmem:[%s1539_s8 + $0x18] sm:$0xff]  ;;  %v376_v38 = vld [vmem:[%s1539_s8 + $0x8] sm:$0xff] }
  0xb2   :  { %v259_v57 = vadd.f32 %v256_v51, %v255_v52  ;;  %v490_v51 = vld [vmem:[%s1542_s2 + $0x60] sm:$0xff]  ;;  %v505_v52 = vld [vmem:[%s1542_s2 + $0xd8] sm:$0xff] }
  0xb4   :  { %v203_v43 = vpop.f32.mrf.mxu2 }
  0xb5   :  { %v1196_v48 = vadd.f32 %v203_v43, %v175_v42  ;;  %v493_v42 = vld [vmem:[%s1542_s2 + $0x78] sm:$0xff]  ;;  %v508_v43 = vld [vmem:[%s1542_s2 + $0xf0] sm:$0xff] }
  0xb6   :  { %526 = vmatpush.msrb.mxu1 %v493_v42  ;;  %556 = vmatpush.msrb.mxu2 %v508_v43 }
  0xb7   :  { %v148_v45 = vpop.f32.mrf.mxu0  ;;  %v257_v54 = vmul.f32 %v1196_v48, %v1196_v48  ;;  %v247_v58 = vadd.f32 %v246_v53, %v1196_v48 }
  0xb8   :  { %v177_v46 = vpop.f32.mrf.mxu1  ;;  %527 = vmatpush.msrb.mxu1 %v492_v44 }
  0xb9   :  { %v178_v50 = vadd.f32 %v177_v46, %v148_v45  ;;  %v260_v60 = vadd.f32 %v259_v57, %v257_v54  ;;  %v507_v45 = vld [vmem:[%s1542_s2 + $0xe8] sm:$0xff]  ;;  %v525_v54 = vld [vmem:[%s1542_s2 + $0x178] sm:$0xff]  ;;  %v524_v57 = vld [vmem:[%s1542_s2 + $0x170] sm:$0xff] }
  0xba   :  { %v491_v46 = vld [vmem:[%s1542_s2 + $0x68] sm:$0xff]  ;;  %557 = vmatpush.msrb.mxu2 %v507_v45 }
  0xbb   :  { %528 = vmatpush.msrb.mxu1 %v491_v46 }
  0xbc   :  { %v206_v55 = vpop.f32.mrf.mxu2 }
  0xbd   :  { %v1206_v56 = vadd.f32 %v206_v55, %v178_v50  ;;  %v506_v50 = vld [vmem:[%s1542_s2 + $0xe0] sm:$0xff]  ;;  %529 = vmatpush.msrb.mxu1 %v490_v51 }
  0xbe   :  { %558 = vmatpush.msrb.mxu2 %v506_v50 }
  0xbf   :  { %v245_v59 = vsel %vm225_vm1, %v1206_v56, 0.0 }
  0xc0   :  { %v248_v61 = vadd.f32 %v247_v58, %v245_v59  ;;  %v258_v62 = vmul.f32 %v245_v59, %v245_v59  ;;  %559 = vmatpush.msrb.mxu2 %v505_v52  ;;  %v523_v58 = vld [vmem:[%s1542_s2 + $0x168] sm:$0xff]  ;;  %v522_v59 = vld [vmem:[%s1542_s2 + $0x160] sm:$0xff] }
  0xc2   :  { %v249_v63 = vrot.slane %v248_v61, 4  ;;  %v261_v0 = vadd.f32 %v260_v60, %v258_v62  ;;  %v489_v60 = vld [vmem:[%s1542_s2 + $0x58] sm:$0xff]  ;;  %v487_v62 = vld [vmem:[%s1542_s2 + $0x48] sm:$0xff] }
  0xc3   :  { %530 = vmatpush.msrb.mxu1 %v489_v60  ;;  %v677_v60 = vld [vmem:[%s1543_s9 + $0x70] sm:$0xff] }
  0xc4   :  { %v262_v1 = vrot.slane %v261_v0, 4  ;;  %v250_v2 = vadd.f32 %v249_v63, %v248_v61  ;;  %v488_v61 = vld [vmem:[%s1542_s2 + $0x50] sm:$0xff]  ;;  %v486_v63 = vld [vmem:[%s1542_s2 + $0x40] sm:$0xff] }
  0xc5   :  { %531 = vmatpush.msrb.mxu1 %v488_v61  ;;  %v693_v61 = vld [vmem:[%s1543_s9 + $0xf0] sm:$0xff] }
  0xc6   :  { %v263_v3 = vadd.f32 %v262_v1, %v261_v0  ;;  %v251_v4 = vrot.slane %v250_v2, 2  ;;  %v521_v0 = vld [vmem:[%s1542_s2 + $0x158] sm:$0xff]  ;;  %v504_v1 = vld [vmem:[%s1542_s2 + $0xd0] sm:$0xff] }
  0xc7   :  { %532 = vmatpush.msrb.mxu1 %v487_v62  ;;  %560 = vmatpush.msrb.mxu2 %v504_v1  ;;  %v676_v62 = vld [vmem:[%s1543_s9 + $0x68] sm:$0xff]  ;;  %v691_v1 = vld [vmem:[%s1543_s9 + $0xe0] sm:$0xff] }
  0xc8   :  { %v252_v5 = vadd.f32 %v251_v4, %v250_v2  ;;  %v264_v6 = vrot.slane %v263_v3, 2  ;;  %v520_v2 = vld [vmem:[%s1542_s2 + $0x150] sm:$0xff]  ;;  %v503_v4 = vld [vmem:[%s1542_s2 + $0xc8] sm:$0xff] }
  0xc9   :  { %533 = vmatpush.msrb.mxu1 %v486_v63  ;;  %561 = vmatpush.msrb.mxu2 %v503_v4  ;;  %v692_v63 = vld [vmem:[%s1543_s9 + $0xe8] sm:$0xff]  ;;  %v673_v4 = vld [vmem:[%s1543_s9 + $0x50] sm:$0xff] }
  0xca   :  { %v253_v7 = vrot.slane %v252_v5, 1  ;;  %v265_v8 = vadd.f32 %v264_v6, %v263_v3  ;;  %v485_v3 = vld [vmem:[%s1542_s2 + $0x38] sm:$0xff]  ;;  %v502_v6 = vld [vmem:[%s1542_s2 + $0xc0] sm:$0xff] }
  0xcb   :  { %534 = vmatpush.msrb.mxu1 %v485_v3  ;;  %562 = vmatpush.msrb.mxu2 %v502_v6  ;;  %v690_v3 = vld [vmem:[%s1543_s9 + $0xd8] sm:$0xff]  ;;  %v689_v6 = vld [vmem:[%s1543_s9 + $0xd0] sm:$0xff] }
  0xcc   :  { %v254_v9 = vadd.f32 %v253_v7, %v252_v5  ;;  %v266_v10 = vrot.slane %v265_v8, 1  ;;  %v519_v5 = vld [vmem:[%s1542_s2 + $0x148] sm:$0xff]  ;;  %v518_v7 = vld [vmem:[%s1542_s2 + $0x140] sm:$0xff] }
  0xce   :  { %316 = vmatmul.f32.vlgmr.msra.gmra.mxu3 %v254_v9  ;;  %v267_v11 = vadd.f32 %v266_v10, %v265_v8  ;;  %v484_v8 = vld [vmem:[%s1542_s2 + $0x30] sm:$0xff]  ;;  %v501_v9 = vld [vmem:[%s1542_s2 + $0xb8] sm:$0xff]  ;;  %v483_v10 = vld [vmem:[%s1542_s2 + $0x28] sm:$0xff] }
  0xcf   :  { %417 = vmatpush.msra.mxu3 %v378_v37  ;;  %535 = vmatpush.msrb.mxu1 %v484_v8  ;;  %v688_v8 = vld [vmem:[%s1543_s9 + $0xc8] sm:$0xff] }
  0xd0   :  { %336 = vmatmul.f32.vlgmr.msrb.gmra.mxu0 %v267_v11  ;;  %563 = vmatpush.msrb.mxu2 %v501_v9  ;;  %v482_v11 = vld [vmem:[%s1542_s2 + $0x20] sm:$0xff] }
  0xd1   :  { %418 = vmatpush.msra.mxu3 %v376_v38  ;;  %536 = vmatpush.msrb.mxu1 %v483_v10  ;;  %v671_v9 = vld [vmem:[%s1543_s9 + $0x40] sm:$0xff] }
  0xd2   :  { %v687_v10 = vld [vmem:[%s1543_s9 + $0xc0] sm:$0xff] }
  0xd3   :  { %537 = vmatpush.msrb.mxu1 %v482_v11  ;;  %v670_v11 = vld [vmem:[%s1543_s9 + $0x38] sm:$0xff] }
 0x14d   :  { %v337_v12 = vpop.f32.mrf.mxu0 }
 0x151   :  { %v317_v13 = vpop.f32.mrf.mxu3 }
 0x152   :  { %v338_v14 = vadd.f32 %v337_v12, %v317_v13  ;;  %v517_v12 = vld [vmem:[%s1542_s2 + $0x138] sm:$0xff] }
 0x153   :  { %v481_v13 = vld [vmem:[%s1542_s2 + $0x18] sm:$0xff] }
 0x154   :  { %v340_v15 = vmul.f32 0.0025510204, %v338_v14  ;;  %538 = vmatpush.msrb.mxu1 %v481_v13  ;;  %v500_v14 = vld [vmem:[%s1542_s2 + $0xb0] sm:$0xff] }
 0x155   :  { %564 = vmatpush.msrb.mxu2 %v500_v14  ;;  %v686_v14 = vld [vmem:[%s1543_s9 + $0xb8] sm:$0xff] }
 0x156   :  { %v341_v16 = vmul.f32 %v340_v15, %v340_v15 }
 0x158   :  { %343 = vrot.lane.b32.xlu0 %v341_v16, %s849_s7  ;;  %v480_v16 = vld [vmem:[%s1542_s2 + $0x10] sm:$0xff] }
 0x159   :  { %539 = vmatpush.msrb.mxu1 %v480_v16  ;;  %v685_v16 = vld [vmem:[%s1543_s9 + $0xb0] sm:$0xff] }
 0x1ca   :  { %v344_v17 = vpop.permute.xlu0 %343 }
 0x1cb   :  { %v346_v18 = vsub.f32 %v340_v15, %v344_v17  ;;  %v499_v17 = vld [vmem:[%s1542_s2 + $0xa8] sm:$0xff] }
 0x1cc   :  { %565 = vmatpush.msrb.mxu2 %v499_v17  ;;  %v668_v17 = vld [vmem:[%s1543_s9 + $0x28] sm:$0xff] }
 0x1cd   :  { %v347_v19 = vmax.f32 %v346_v18, 0.0  ;;  %v515_v18 = vld [vmem:[%s1542_s2 + $0x128] sm:$0xff] }
 0x1cf   :  { %v349_v20 = vadd.f32 1e-05, %v347_v19  ;;  %v479_v19 = vld [vmem:[%s1542_s2 + $0x8] sm:$0xff] }
 0x1d0   :  { %540 = vmatpush.msrb.mxu1 %v479_v19  ;;  %v684_v19 = vld [vmem:[%s1543_s9 + $0xa8] sm:$0xff] }
 0x1d1   :  { %845 = vrsqrt.f32 %v349_v20  ;;  %vm356_vm3 = vweird.f32 %v349_v20 }
 0x1d7   :  { %v846_v21 = vpop.eup %845 }
 0x1d8   :  { %v351_v22 = vmul.f32 %v846_v21, %v349_v20  ;;  %vm357_vm2 = vweird.f32 %v846_v21  ;;  %v498_v20 = vld [vmem:[%s1542_s2 + $0xa0] sm:$0xff] }
 0x1d9   :  { %vm358_vm4 = vmor %vm356_vm3, %vm357_vm2  ;;  %566 = vmatpush.msrb.mxu2 %v498_v20  ;;  %v667_v20 = vld [vmem:[%s1543_s9 + $0x20] sm:$0xff] }
 0x1da   :  { %v352_v23 = vmul.f32 %v846_v21, %v351_v22  ;;  %v478_v22 = vld [vmem:[%s1542_s2] sm:$0xff] }
 0x1db   :  { %541 = vmatpush.msrb.mxu1 %v478_v22  ;;  %v666_v22 = vld [vmem:[%s1543_s9 + $0x18] sm:$0xff] }
 0x1dc   :  { %v353_v24 = vmul.f32 0.5, %v352_v23  ;;  %v497_v23 = vld [vmem:[%s1542_s2 + $0x98] sm:$0xff] }
 0x1dd   :  { %567 = vmatpush.msrb.mxu2 %v497_v23  ;;  %v682_v23 = vld [vmem:[%s1543_s9 + $0x98] sm:$0xff] }
 0x1de   :  { %v354_v25 = vsub.f32 1.5, %v353_v24  ;;  %v513_v24 = vld [vmem:[%s1542_s2 + $0x118] sm:$0xff] }
 0x1e0   :  { %v355_v26 = vmul.f32 %v846_v21, %v354_v25  ;;  %v496_v25 = vld [vmem:[%s1542_s2 + $0x90] sm:$0xff] }
 0x1e1   :  { %568 = vmatpush.msrb.mxu2 %v496_v25 }
 0x1e2   :  { %v359_v27 = vsel %vm358_vm4, %v846_v21, %v355_v26  ;;  %v514_v21 = vld [vmem:[%s1542_s2 + $0x120] sm:$0xff]  ;;  %v851_v26 = vmov 0.0  }
 0x1e3   :  { %361 = vrot.lane.b32.xlu0 %v359_v27, %s850_s23  ;;  %441 = vst [vmem:[#allocation2 + $0x20] sm:$0xff] %v851_v26  ;;  %v512_v27 = vld [vmem:[%s1542_s2 + $0x110] sm:$0xff]  ;;  %569 = vmatpush.msrb.mxu2 %v495_v28  ;;  %v664_v28 = vld [vmem:[%s1543_s9 + $0x8] sm:$0xff] }
 0x255   :  { %v362_v31 = vpop.permute.xlu0 %361 }
 0x256   :  { %v364_v32 = vmul.f32 %v362_v31, %v348_v30  ;;  %v494_v30 = vld [vmem:[%s1542_s2 + $0x80] sm:$0xff] }
 0x257   :  { %v510_v31 = vld [vmem:[%s1542_s2 + $0x100] sm:$0xff]  ;;  %570 = vmatpush.msrb.mxu2 %v494_v30 }
 0x258   :  { %v366_v34 = vmul.f32 %v364_v32, %v340_v15  ;;  %v516_v15 = vld [vmem:[%s1542_s2 + $0x130] sm:$0xff]  ;;  %v663_v30 = vld [vmem:[%s1543_s9] sm:$0xff] }
 0x25a   :  { %v367_v35 = vsub.f32 %v365_v33, %v366_v34 }
 0x25c   :  { %v369_v36 = vperm.slane %v367_v35, 0 }
 0x25e   :  { %370 = vrot.lane.b32.xlu1 %v369_v36, %s849_s7 }
 0x2d0   :  { %v371_v53 = vpop.permute.xlu1 %370 }
 0x2d1   :  { %v374_v55 = vsel %vm373_vm5, %v364_v32, %v371_v53 }
 0x2d2   :  { %838 = vmatmul.msk.f32.vlgmr.msrb.gmra.mxu3 %vm379_vm6, %v374_v55 }
 0x2d3   :  { %584 = vmatpush.msrb.mxu3 %v525_v54 }
 0x2d5   :  { %585 = vmatpush.msrb.mxu3 %v524_v57 }
 0x2d7   :  { %586 = vmatpush.msrb.mxu3 %v523_v58  ;;  %v678_v58 = vld [vmem:[%s1543_s9 + $0x78] sm:$0xff] }
 0x2d8   :  { %695 = vmatpush.msra.mxu0 %v678_v58 }
 0x2d9   :  { %587 = vmatpush.msrb.mxu3 %v522_v59  ;;  %v694_v59 = vld [vmem:[%s1543_s9 + $0xf8] sm:$0xff] }
 0x2da   :  { %839 = vmatmul.msk.f32.vlgmr.msra.gmra.mxu3 %vm379_vm6, %v374_v55  ;;  %715 = vmatpush.msra.mxu1 %v694_v59 }
 0x2db   :  { %588 = vmatpush.msrb.mxu3 %v521_v0  ;;  %696 = vmatpush.msra.mxu0 %v677_v60  ;;  %v675_v0 = vld [vmem:[%s1543_s9 + $0x60] sm:$0xff] }
 0x2dc   :  { %716 = vmatpush.msra.mxu1 %v693_v61 }
 0x2dd   :  { %589 = vmatpush.msrb.mxu3 %v520_v2  ;;  %697 = vmatpush.msra.mxu0 %v676_v62  ;;  %v674_v2 = vld [vmem:[%s1543_s9 + $0x58] sm:$0xff] }
 0x2de   :  { %717 = vmatpush.msra.mxu1 %v692_v63 }
 0x2df   :  { %590 = vmatpush.msrb.mxu3 %v519_v5  ;;  %698 = vmatpush.msra.mxu0 %v675_v0 }
 0x2e0   :  { %718 = vmatpush.msra.mxu1 %v691_v1 }
 0x2e1   :  { %591 = vmatpush.msrb.mxu3 %v518_v7  ;;  %699 = vmatpush.msra.mxu0 %v674_v2  ;;  %v672_v7 = vld [vmem:[%s1543_s9 + $0x48] sm:$0xff] }
 0x2e2   :  { %719 = vmatpush.msra.mxu1 %v690_v3 }
 0x2e3   :  { %592 = vmatpush.msrb.mxu3 %v517_v12  ;;  %700 = vmatpush.msra.mxu0 %v673_v4 }
 0x2e4   :  { %720 = vmatpush.msra.mxu1 %v689_v6 }
 0x2e5   :  { %593 = vmatpush.msrb.mxu3 %v516_v15  ;;  %701 = vmatpush.msra.mxu0 %v672_v7  ;;  %v669_v15 = vld [vmem:[%s1543_s9 + $0x30] sm:$0xff] }
 0x2e6   :  { %721 = vmatpush.msra.mxu1 %v688_v8 }
 0x2e7   :  { %594 = vmatpush.msrb.mxu3 %v515_v18  ;;  %702 = vmatpush.msra.mxu0 %v671_v9 }
 0x2e8   :  { %722 = vmatpush.msra.mxu1 %v687_v10 }
 0x2e9   :  { %595 = vmatpush.msrb.mxu3 %v514_v21  ;;  %703 = vmatpush.msra.mxu0 %v670_v11  ;;  %v683_v21 = vld [vmem:[%s1543_s9 + $0xa0] sm:$0xff] }
 0x2ea   :  { %723 = vmatpush.msra.mxu1 %v686_v14 }
 0x2eb   :  { %596 = vmatpush.msrb.mxu3 %v513_v24  ;;  %704 = vmatpush.msra.mxu0 %v669_v15  ;;  %v665_v24 = vld [vmem:[%s1543_s9 + $0x10] sm:$0xff] }
 0x2ec   :  { %724 = vmatpush.msra.mxu1 %v685_v16 }
 0x2ed   :  { %597 = vmatpush.msrb.mxu3 %v512_v27  ;;  %705 = vmatpush.msra.mxu0 %v668_v17  ;;  %v681_v27 = vld [vmem:[%s1543_s9 + $0x90] sm:$0xff] }
 0x2ee   :  { %725 = vmatpush.msra.mxu1 %v684_v19 }
 0x2ef   :  { %598 = vmatpush.msrb.mxu3 %v511_v29  ;;  %706 = vmatpush.msra.mxu0 %v667_v20  ;;  %v680_v29 = vld [vmem:[%s1543_s9 + $0x88] sm:$0xff] }
 0x2f0   :  { %726 = vmatpush.msra.mxu1 %v683_v21 }
 0x2f1   :  { %599 = vmatpush.msrb.mxu3 %v510_v31  ;;  %707 = vmatpush.msra.mxu0 %v666_v22  ;;  %v771_v22 = vld [vmem:[%s1544_s10 + $0x10] sm:$0xff] }
 0x2f2   :  { %727 = vmatpush.msra.mxu1 %v682_v23  ;;  %v769_v23 = vld [vmem:[%s1544_s10] sm:$0xff]  ;;  %790 = vmatpush.msra.mxu2 %v771_v22 }
 0x2f3   :  { %708 = vmatpush.msra.mxu0 %v665_v24  ;;  %v772_v24 = vld [vmem:[%s1544_s10 + $0x18] sm:$0xff] }
 0x2f4   :  { %728 = vmatpush.msra.mxu1 %v681_v27  ;;  %791 = vmatpush.msra.mxu2 %v769_v23 }
 0x2f5   :  { %709 = vmatpush.msra.mxu0 %v664_v28  ;;  %v760_v28 = vld [vmem:[%s1546_s6] sm:$0x1] }
 0x2f6   :  { %729 = vmatpush.msra.mxu1 %v680_v29 }
 0x2f7   :  { %710 = vmatpush.msra.mxu0 %v663_v30 }
 0x2f9   :  { %810 = vmatpush.msrb.mxu0 %v772_v24 }
 0x355   :  { %v400_v32 = vpop.f32.mrf.mxu3 }
 0x356   :  { %v423_v33 = vperm.slane %v400_v32, 0  ;;  %v679_v32 = vld [vmem:[%s1543_s9 + $0x80] sm:$0xff] }
 0x357   :  { %730 = vmatpush.msra.mxu1 %v679_v32  ;;  %v770_v32 = vld [vmem:[%s1544_s10 + $0x8] sm:$0xff] }
 0x358   :  { %v424_v34 = vmul.f32 %v423_v33, %v1194_v47  ;;  %v425_v36 = vmul.f32 %v423_v33, %v1190_v40  ;;  %v426_v37 = vmul.f32 %v423_v33, %v1196_v48  ;;  %v427_v38 = vmul.f32 %v423_v33, %v1206_v56  ;;  %811 = vmatpush.msrb.mxu0 %v770_v32 }
 0x35d   :  { %v420_v35 = vpop.f32.mrf.mxu3 }
 0x35e   :  { %v428_v41 = vperm.slane %v420_v35, 0 }
 0x360   :  { %v429_v42 = vadd.f32 %v428_v41, %v424_v34  ;;  %v430_v43 = vadd.f32 %v428_v41, %v425_v36  ;;  %v431_v44 = vadd.f32 %v428_v41, %v426_v37  ;;  %v432_v45 = vadd.f32 %v428_v41, %v427_v38 }
 0x362   :  { %v433_v46 = vmax.f32 %v429_v42, 0.0  ;;  %v434_v50 = vmax.f32 %v430_v43, 0.0  ;;  %v435_v51 = vmax.f32 %v431_v44, 0.0  ;;  %v436_v52 = vmax.f32 %v432_v45, 0.0 }
 0x364   :  { %437 = vst [vmem:[#allocation2] sm:$0xff] %v433_v46  ;;  %542 = vmatmul.f32.vlgmr.msrb.gmra.mxu1 %v433_v46 }
 0x365   :  { %438 = vst [vmem:[#allocation2 + $0x8] sm:$0xff] %v434_v50 }
 0x366   :  { %439 = vst [vmem:[#allocation2 + $0x10] sm:$0xff] %v435_v51 }
 0x367   :  { %440 = vst [vmem:[#allocation2 + $0x18] sm:$0xff] %v436_v52 }
 0x36c   :  { %v450_v47 = vld [vmem:[#allocation2 + $0x1] sm:$0xff]  ;;  %545 = vmatmul.f32.gmra.mxu1 %v434_v50 }
 0x36d   :  { %v458_v40 = vld [vmem:[#allocation2 + $0x2] sm:$0xff]  ;;  %571 = vmatmul.f32.vlgmr.msrb.gmra.mxu2 %v450_v47  ;;  %v459_v56 = vld [vmem:[#allocation2 + $0xa] sm:$0xff] }
 0x36e   :  { %600 = vmatmul.f32.vlgmr.msrb.gmra.mxu3 %v458_v40  ;;  %v451_v48 = vld [vmem:[#allocation2 + $0x9] sm:$0xff]  ;;  %v452_v53 = vld [vmem:[#allocation2 + $0x11] sm:$0xff]  ;;  %v453_v55 = vld [vmem:[#allocation2 + $0x19] sm:$0xff] }
 0x36f   :  { %v460_v54 = vld [vmem:[#allocation2 + $0x12] sm:$0xff]  ;;  %v461_v57 = vld [vmem:[#allocation2 + $0x1a] sm:$0xff] }
 0x374   :  { %548 = vmatmul.f32.gmra.mxu1 %v435_v51 }
 0x375   :  { %574 = vmatmul.f32.gmra.mxu2 %v451_v48 }
 0x376   :  { %603 = vmatmul.f32.gmra.mxu3 %v459_v56 }
 0x37c   :  { %551 = vmatmul.f32.gmra.mxu1 %v436_v52 }
 0x37d   :  { %577 = vmatmul.f32.gmra.mxu2 %v452_v53 }
 0x37e   :  { %606 = vmatmul.f32.gmra.mxu3 %v460_v54 }
 0x385   :  { %580 = vmatmul.f32.gmra.mxu2 %v453_v55 }
 0x386   :  { %609 = vmatmul.f32.gmra.mxu3 %v461_v57 }
 0x3e1   :  { %v543_v5 = vpop.f32.mrf.mxu1 }
 0x3e9   :  { %v546_v18 = vpop.f32.mrf.mxu1 }
 0x3f0   :  { %v572_v12 = vpop.f32.mrf.mxu2 }
 0x3f1   :  { %v601_v13 = vpop.f32.mrf.mxu3  ;;  %v549_v33 = vpop.f32.mrf.mxu1  ;;  %v573_v37 = vadd.f32 %v572_v12, %v543_v5 }
 0x3f3   :  { %v1482_v42 = vadd.f32 %v601_v13, %v573_v37 }
 0x3f5   :  { %v650_v51 = vmul.f32 %v1482_v42, %v1482_v42 }
 0x3f8   :  { %v575_v25 = vpop.f32.mrf.mxu2 }
 0x3f9   :  { %v604_v26 = vpop.f32.mrf.mxu3  ;;  %v576_v31 = vadd.f32 %v575_v25, %v546_v18  ;;  %v552_v45 = vpop.f32.mrf.mxu1  ;;  %v743_v25 = vld [vmem:[%s1545_s5] sm:$0x1] }
 0x3fb   :  { %v1478_v36 = vadd.f32 %v604_v26, %v576_v31 }
 0x3fd   :  { %v638_v41 = vsel %vm614_vm7, %v1478_v36, 0.0 }
 0x3fe   :  { %v651_v44 = vmul.f32 %v638_v41, %v638_v41  ;;  %v641_v52 = vadd.f32 %v638_v41, %v1482_v42 }
 0x400   :  { %v578_v34 = vpop.f32.mrf.mxu2  ;;  %v654_v48 = vadd.f32 %v651_v44, %v650_v51 }
 0x401   :  { %v607_v35 = vpop.f32.mrf.mxu3  ;;  %v579_v38 = vadd.f32 %v578_v34, %v549_v33 }
 0x403   :  { %v1484_v43 = vadd.f32 %v607_v35, %v579_v38 }
 0x405   :  { %v652_v47 = vmul.f32 %v1484_v43, %v1484_v43  ;;  %v642_v56 = vadd.f32 %v641_v52, %v1484_v43 }
 0x407   :  { %v655_v54 = vadd.f32 %v654_v48, %v652_v47 }
 0x408   :  { %v581_v46 = vpop.f32.mrf.mxu2 }
 0x409   :  { %v582_v50 = vadd.f32 %v581_v46, %v552_v45  ;;  %v610_v39 = vpop.f32.mrf.mxu3 }
 0x40b   :  { %v1492_v40 = vadd.f32 %v610_v39, %v582_v50 }
 0x40d   :  { %v640_v53 = vsel %vm620_vm8, %v1492_v40, 0.0 }
 0x40e   :  { %v643_v55 = vadd.f32 %v642_v56, %v640_v53  ;;  %v653_v57 = vmul.f32 %v640_v53, %v640_v53 }
 0x410   :  { %v644_v58 = vrot.slane %v643_v55, 4  ;;  %v656_v59 = vadd.f32 %v655_v54, %v653_v57 }
 0x412   :  { %v645_v60 = vadd.f32 %v644_v58, %v643_v55  ;;  %v657_v61 = vrot.slane %v656_v59, 4 }
 0x414   :  { %v646_v62 = vrot.slane %v645_v60, 2  ;;  %v658_v63 = vadd.f32 %v657_v61, %v656_v59 }
 0x416   :  { %v647_v0 = vadd.f32 %v646_v62, %v645_v60  ;;  %v659_v1 = vrot.slane %v658_v63, 2 }
 0x418   :  { %v648_v2 = vrot.slane %v647_v0, 1  ;;  %v660_v49 = vadd.f32 %v659_v1, %v658_v63 }
 0x41a   :  { %v649_v3 = vadd.f32 %v648_v2, %v647_v0  ;;  %v661_v4 = vrot.slane %v660_v49, 1 }
 0x41c   :  { %711 = vmatmul.f32.vlgmr.msra.gmra.mxu0 %v649_v3  ;;  %v662_v5 = vadd.f32 %v661_v4, %v660_v49 }
 0x41e   :  { %731 = vmatmul.f32.vlgmr.msra.gmra.mxu1 %v662_v5 }
 0x499   :  { %v712_v6 = vpop.f32.mrf.mxu0 }
 0x49b   :  { %v732_v7 = vpop.f32.mrf.mxu1 }
 0x49c   :  { %v733_v8 = vadd.f32 %v732_v7, %v712_v6 }
 0x49e   :  { %v735_v9 = vmul.f32 0.0034722222, %v733_v8 }
 0x4a0   :  { %v736_v10 = vmul.f32 %v735_v9, %v735_v9 }
 0x4a2   :  { %738 = vrot.lane.b32.xlu1 %v736_v10, %s849_s7 }
 0x514   :  { %v739_v11 = vpop.permute.xlu1 %738 }
 0x515   :  { %v741_v12 = vsub.f32 %v735_v9, %v739_v11 }
 0x517   :  { %v742_v13 = vmax.f32 %v741_v12, 0.0 }
 0x519   :  { %v744_v14 = vadd.f32 1e-05, %v742_v13 }
 0x51b   :  { %847 = vrsqrt.f32 %v744_v14  ;;  %vm751_vm10 = vweird.f32 %v744_v14 }
 0x521   :  { %v848_v15 = vpop.eup %847 }
 0x522   :  { %v746_v16 = vmul.f32 %v848_v15, %v744_v14  ;;  %vm752_vm9 = vweird.f32 %v848_v15 }
 0x523   :  { %vm753_vm11 = vmor %vm751_vm10, %vm752_vm9 }
 0x524   :  { %v747_v17 = vmul.f32 %v848_v15, %v746_v16 }
 0x526   :  { %v748_v18 = vmul.f32 0.5, %v747_v17 }
 0x528   :  { %v749_v19 = vsub.f32 1.5, %v748_v18 }
 0x52a   :  { %v750_v20 = vmul.f32 %v848_v15, %v749_v19 }
 0x52c   :  { %v754_v21 = vsel %vm753_vm11, %v848_v15, %v750_v20 }
 0x52d   :  { %756 = vrot.lane.b32.xlu2 %v754_v21, %s850_s23 }
 0x587   :  { %v757_v26 = vpop.permute.xlu2 %756 }
 0x588   :  { %v759_v27 = vmul.f32 %v757_v26, %v743_v25 }
 0x58a   :  { %v761_v29 = vmul.f32 %v759_v27, %v735_v9 }
 0x58c   :  { %v762_v30 = vsub.f32 %v760_v28, %v761_v29 }
 0x58e   :  { %v764_v31 = vperm.slane %v762_v30, 0 }
 0x590   :  { %765 = vrot.lane.b32.xlu2 %v764_v31, %s849_s7 }
 0x5ea   :  { %v766_v33 = vpop.permute.xlu2 %765 }
 0x5eb   :  { %v768_v34 = vsel %vm373_vm5, %v759_v27, %v766_v33 }
 0x5ec   :  { %840 = vmatmul.msk.f32.vlgmr.msra.gmra.mxu2 %vm379_vm6, %v768_v34  ;;  %841 = vmatmul.msk.f32.vlgmr.msrb.gmra.mxu0 %vm379_vm6, %v768_v34 }
 0x669   :  { %v813_v35 = vpop.f32.mrf.mxu0 }
 0x66a   :  { %v821_v41 = vperm.slane %v813_v35, 0 }
 0x66f   :  { %v793_v37 = vpop.f32.mrf.mxu2 }
 0x670   :  { %v816_v38 = vperm.slane %v793_v37, 0 }
 0x672   :  { %v817_v44 = vmul.f32 %v816_v38, %v1482_v42  ;;  %v818_v45 = vmul.f32 %v816_v38, %v1478_v36  ;;  %v819_v46 = vmul.f32 %v816_v38, %v1484_v43  ;;  %v820_v50 = vmul.f32 %v816_v38, %v1492_v40 }
 0x674   :  { %v822_v51 = vadd.f32 %v821_v41, %v817_v44  ;;  %v823_v52 = vadd.f32 %v821_v41, %v818_v45  ;;  %v824_v47 = vadd.f32 %v821_v41, %v819_v46  ;;  %v825_v39 = vadd.f32 %v821_v41, %v820_v50 }
 0x676   :  { %v826_v48 = vmax.f32 %v822_v51, 0.0  ;;  %v827_v56 = vmax.f32 %v823_v52, 0.0  ;;  %v828_v53 = vmax.f32 %v824_v47, 0.0  ;;  %v829_v54 = vmax.f32 %v825_v39, 0.0 }
 0x678   :  { %830 = vst [vmem:[%s1547_s11] sm:$0xff] %v826_v48 }
 0x679   :  { %831 = vst [vmem:[%s1547_s11 + $0x8] sm:$0xff] %v827_v56 }
 0x67a   :  { %832 = vst [vmem:[%s1547_s11 + $0x10] sm:$0xff] %v828_v53 }
 0x67b   :  { %833 = vst [vmem:[%s1547_s11 + $0x18] sm:$0xff] %v829_v54 }

</bundles_post_ra>
